<compile_context>
chip_gen: v6e
topology: v6e:2x2x1
jax: 0.10.0
libtpu: 0.0.40
codegen_flags: <defaults>
</compile_context>

<pallas_src>
import jax
import jax.numpy as jnp
from jax.experimental import pallas as pl
from jax.experimental.pallas import tpu as pltpu


def attention_rnn_kernel(x_ref, wx_ref, wh_ref, bih_ref, who_ref, bho_ref,
                         y_ref):
    TB, D = x_ref.shape                    # x is time-major, flattened (T*B, D)
    H = wh_ref.shape[0]
    B, O = y_ref.shape
    T = TB // B

    # ---- input projection hoisted out of the recurrence (one MXU matmul) ----
    xw = (jnp.dot(x_ref[...], wx_ref[...],
                  preferred_element_type=jnp.float32)
          + bih_ref[...])                                      # (T*B, H)

    # Loop-invariant recurrent weight, loaded once.
    wh = wh_ref[...]                                           # (H, H)

    # ---- serial recurrence:  h_t = tanh(xw_t + h_{t-1} @ Wh) ----
    # (exact split of the concat-then-matmul form of nn.Linear(D+H, H))
    h = jnp.zeros((B, H), dtype=jnp.float32)
    hs = []                                                    # history in vregs
    for t in range(T):                                         # T static -> unrolled
        xw_t = xw[t * B:(t + 1) * B, :]                        # contiguous slice
        h = jnp.tanh(xw_t
                     + jnp.dot(h, wh, preferred_element_type=jnp.float32))
        hs.append(h)

    hidden_tbh = jnp.stack(hs, axis=0)                         # (T, B, H), prod. order
    hidden_bth = jnp.transpose(hidden_tbh, (1, 0, 2))          # (B, T, H), one XLU pass
    final = h                                                  # == hidden_seq[:, -1, :]

    # ---- attention scores: lane reduce over H ----
    scores = jnp.sum(hidden_bth * final[:, None, :], axis=-1)  # (B, T)

    # ---- stable softmax over the sequence axis (last axis, lane-dense) ----
    m = jnp.max(scores, axis=-1, keepdims=True)
    e = jnp.exp(scores - m)
    denom = jnp.sum(e, axis=-1, keepdims=True)
    attn = e * pl.reciprocal(denom, approx=True)               # EUP recip, free slot

    # ---- context: weighted sum of hidden states over time ----
    ctx = jnp.sum(attn[:, :, None] * hidden_bth, axis=1)       # (B, H)

    # ---- output projection ----
    y = (jnp.dot(ctx, who_ref[...], preferred_element_type=jnp.float32)
         + bho_ref[...])
    y_ref[...] = y.astype(y_ref.dtype)


def prepare_params(w_ih, b_ih, w_ho, b_ho, input_size):
    """One-time weight split/transpose (hoisted out of the per-call path)."""
    D = input_size
    H = w_ih.shape[0]
    O = w_ho.shape[0]
    wx = jnp.transpose(w_ih[:, :D])          # (D, H)
    wh = jnp.transpose(w_ih[:, D:])          # (H, H)
    who = jnp.transpose(w_ho)                # (H, O)
    bih = b_ih.reshape(1, H)
    bho = b_ho.reshape(1, O)
    return wx, wh, bih, who, bho


@jax.jit
def attention_rnn(x, wx, wh, bih, who, bho):
    """x: (B, T, D); weights pre-transposed by prepare_params()."""
    B, T, D = x.shape
    H = wh.shape[0]
    O = who.shape[1]

    # Time-major, flattened input: the reshape lives here (XLA), not the kernel,
    # so each in-kernel per-step read is a contiguous sublane slice.
    x_tb = jnp.transpose(x, (1, 0, 2)).reshape(T * B, D)

    flops = (2 * T * B * D * H          # input projection
             + 2 * T * B * H * H        # recurrence
             + 4 * B * T * H            # scores + context
             + 2 * B * H * O)           # output projection
    transcendentals = T * B * H + B * T  # tanh + exp
    bytes_accessed = 4 * (T * B * D + D * H + H * H + H + H * O + O + B * O)

    vmem = pl.BlockSpec(memory_space=pltpu.MemorySpace.VMEM)
    return pl.pallas_call(
        attention_rnn_kernel,
        out_shape=jax.ShapeDtypeStruct((B, O), x.dtype),
        in_specs=[vmem] * 6,
        out_specs=vmem,
        cost_estimate=pl.CostEstimate(flops=flops,
                                      transcendentals=transcendentals,
                                      bytes_accessed=bytes_accessed),
    )(x_tb, wx, wh, bih, who, bho)


def attention_rnn_ref(x, w_ih, b_ih, w_ho, b_ho):
    """Pure-JAX reference mirroring the PyTorch forward."""
    B, T, D = x.shape
    H = w_ih.shape[0]
    h = jnp.zeros((B, H), dtype=x.dtype)
    hs = []
    for t in range(T):
        combined = jnp.concatenate([x[:, t, :], h], axis=1)
        h = jnp.tanh(combined @ w_ih.T + b_ih)
        hs.append(h[:, None, :])
    hidden_seq = jnp.concatenate(hs, axis=1)                   # (B, T, H)
    final = hidden_seq[:, -1, :]                               # (B, H)
    scores = jnp.einsum('bth,bh->bt', hidden_seq, final)
    attn = jax.nn.softmax(scores, axis=1)
    ctx = jnp.einsum('bt,bth->bh', attn, hidden_seq)
    return ctx @ w_ho.T + b_ho


def xavier_uniform(key, shape, dtype=jnp.float32):
    fan_out, fan_in = shape
    limit = (6.0 / (fan_in + fan_out)) ** 0.5
    return jax.random.uniform(key, shape, dtype, minval=-limit, maxval=limit)


if __name__ == "__main__":
    # B=8 fills the 8 sublanes of a vreg; other dims kept small per the module.
    B, T, D, H, O = 8, 8, 16, 32, 8

    key = jax.random.PRNGKey(0)
    kx, kw1, kw2 = jax.random.split(key, 3)

    x = jax.random.normal(kx, (B, T, D), dtype=jnp.float32)
    w_ih = xavier_uniform(kw1, (H, D + H))     # input_to_hidden.weight
    b_ih = jnp.zeros((H,), jnp.float32)        # input_to_hidden.bias (zeros, per spec)
    w_ho = xavier_uniform(kw2, (O, H))         # hidden_to_output.weight
    b_ho = jnp.zeros((O,), jnp.float32)        # hidden_to_output.bias (zeros, per spec)

    params = prepare_params(w_ih, b_ih, w_ho, b_ho, D)
    y = attention_rnn(x, *params)
    y = jax.block_until_ready(y)

    y_ref = attention_rnn_ref(x, w_ih, b_ih, w_ho, b_ho)
    # Tolerance loosened vs. 1e-5 only because the softmax denominator uses the
    # EUP approx reciprocal (~1e-3 relative); everything else is exact f32.
    assert jnp.allclose(y, y_ref, atol=1e-2, rtol=1e-2), "mismatch vs reference"

    print("KERNEL_OK")
</pallas_src>

<mosaic_0001>
module attributes {stable_mosaic.version = 11 : i64} {
  func.func @attention_rnn_kernel(%arg0: memref<64x16xf32, #tpu.memory_space<vmem>>, %arg1: memref<16x32xf32, #tpu.memory_space<vmem>>, %arg2: memref<32x32xf32, #tpu.memory_space<vmem>>, %arg3: memref<1x32xf32, #tpu.memory_space<vmem>>, %arg4: memref<32x8xf32, #tpu.memory_space<vmem>>, %arg5: memref<1x8xf32, #tpu.memory_space<vmem>>, %arg6: memref<8x8xf32, #tpu.memory_space<vmem>>) attributes {dimension_semantics = [], scalar_prefetch = 0 : i64, scratch_operands = 0 : i64, tpu.core_type = #tpu.core_type<tc>} {
    %c0 = arith.constant 0 : index
    %c0_0 = arith.constant 0 : index
    %0 = vector.load %arg0[%c0, %c0_0] : memref<64x16xf32, #tpu.memory_space<vmem>>, vector<64x16xf32>
    %c0_1 = arith.constant 0 : index
    %c0_2 = arith.constant 0 : index
    %1 = vector.load %arg1[%c0_1, %c0_2] : memref<16x32xf32, #tpu.memory_space<vmem>>, vector<16x32xf32>
    %cst = arith.constant dense<0.000000e+00> : vector<64x32xf32>
    %2 = tpu.matmul %0, %1, %cst {dimension_numbers = #tpu.dot_dimension_numbers<[1], [0], [0], [1], [0, 0, 1, 1], [], []>} : vector<64x16xf32>, vector<16x32xf32>, vector<64x32xf32> -> vector<64x32xf32>
    %c0_3 = arith.constant 0 : index
    %c0_4 = arith.constant 0 : index
    %3 = vector.load %arg3[%c0_3, %c0_4] : memref<1x32xf32, #tpu.memory_space<vmem>>, vector<1x32xf32>
    %4 = vector.broadcast %3 : vector<1x32xf32> to vector<64x32xf32>
    %5 = arith.addf %2, %4 : vector<64x32xf32>
    %c0_5 = arith.constant 0 : index
    %c0_6 = arith.constant 0 : index
    %6 = vector.load %arg2[%c0_5, %c0_6] : memref<32x32xf32, #tpu.memory_space<vmem>>, vector<32x32xf32>
    %cst_7 = arith.constant 0.000000e+00 : f32
    %7 = vector.broadcast %cst_7 : f32 to vector<8x32xf32>
    %8 = vector.extract_strided_slice %5 {offsets = [0, 0], sizes = [8, 32], strides = [1, 1]} : vector<64x32xf32> to vector<8x32xf32>
    %cst_8 = arith.constant dense<0.000000e+00> : vector<8x32xf32>
    %9 = tpu.matmul %7, %6, %cst_8 {dimension_numbers = #tpu.dot_dimension_numbers<[1], [0], [0], [1], [0, 0, 1, 1], [], []>} : vector<8x32xf32>, vector<32x32xf32>, vector<8x32xf32> -> vector<8x32xf32>
    %10 = arith.addf %8, %9 : vector<8x32xf32>
    %11 = math.tanh %10 : vector<8x32xf32>
    %12 = vector.extract_strided_slice %5 {offsets = [8, 0], sizes = [8, 32], strides = [1, 1]} : vector<64x32xf32> to vector<8x32xf32>
    %cst_9 = arith.constant dense<0.000000e+00> : vector<8x32xf32>
    %13 = tpu.matmul %11, %6, %cst_9 {dimension_numbers = #tpu.dot_dimension_numbers<[1], [0], [0], [1], [0, 0, 1, 1], [], []>} : vector<8x32xf32>, vector<32x32xf32>, vector<8x32xf32> -> vector<8x32xf32>
    %14 = arith.addf %12, %13 : vector<8x32xf32>
    %15 = math.tanh %14 : vector<8x32xf32>
    %16 = vector.extract_strided_slice %5 {offsets = [16, 0], sizes = [8, 32], strides = [1, 1]} : vector<64x32xf32> to vector<8x32xf32>
    %cst_10 = arith.constant dense<0.000000e+00> : vector<8x32xf32>
    %17 = tpu.matmul %15, %6, %cst_10 {dimension_numbers = #tpu.dot_dimension_numbers<[1], [0], [0], [1], [0, 0, 1, 1], [], []>} : vector<8x32xf32>, vector<32x32xf32>, vector<8x32xf32> -> vector<8x32xf32>
    %18 = arith.addf %16, %17 : vector<8x32xf32>
    %19 = math.tanh %18 : vector<8x32xf32>
    %20 = vector.extract_strided_slice %5 {offsets = [24, 0], sizes = [8, 32], strides = [1, 1]} : vector<64x32xf32> to vector<8x32xf32>
    %cst_11 = arith.constant dense<0.000000e+00> : vector<8x32xf32>
    %21 = tpu.matmul %19, %6, %cst_11 {dimension_numbers = #tpu.dot_dimension_numbers<[1], [0], [0], [1], [0, 0, 1, 1], [], []>} : vector<8x32xf32>, vector<32x32xf32>, vector<8x32xf32> -> vector<8x32xf32>
    %22 = arith.addf %20, %21 : vector<8x32xf32>
    %23 = math.tanh %22 : vector<8x32xf32>
    %24 = vector.extract_strided_slice %5 {offsets = [32, 0], sizes = [8, 32], strides = [1, 1]} : vector<64x32xf32> to vector<8x32xf32>
    %cst_12 = arith.constant dense<0.000000e+00> : vector<8x32xf32>
    %25 = tpu.matmul %23, %6, %cst_12 {dimension_numbers = #tpu.dot_dimension_numbers<[1], [0], [0], [1], [0, 0, 1, 1], [], []>} : vector<8x32xf32>, vector<32x32xf32>, vector<8x32xf32> -> vector<8x32xf32>
    %26 = arith.addf %24, %25 : vector<8x32xf32>
    %27 = math.tanh %26 : vector<8x32xf32>
    %28 = vector.extract_strided_slice %5 {offsets = [40, 0], sizes = [8, 32], strides = [1, 1]} : vector<64x32xf32> to vector<8x32xf32>
    %cst_13 = arith.constant dense<0.000000e+00> : vector<8x32xf32>
    %29 = tpu.matmul %27, %6, %cst_13 {dimension_numbers = #tpu.dot_dimension_numbers<[1], [0], [0], [1], [0, 0, 1, 1], [], []>} : vector<8x32xf32>, vector<32x32xf32>, vector<8x32xf32> -> vector<8x32xf32>
    %30 = arith.addf %28, %29 : vector<8x32xf32>
    %31 = math.tanh %30 : vector<8x32xf32>
    %32 = vector.extract_strided_slice %5 {offsets = [48, 0], sizes = [8, 32], strides = [1, 1]} : vector<64x32xf32> to vector<8x32xf32>
    %cst_14 = arith.constant dense<0.000000e+00> : vector<8x32xf32>
    %33 = tpu.matmul %31, %6, %cst_14 {dimension_numbers = #tpu.dot_dimension_numbers<[1], [0], [0], [1], [0, 0, 1, 1], [], []>} : vector<8x32xf32>, vector<32x32xf32>, vector<8x32xf32> -> vector<8x32xf32>
    %34 = arith.addf %32, %33 : vector<8x32xf32>
    %35 = math.tanh %34 : vector<8x32xf32>
    %36 = vector.extract_strided_slice %5 {offsets = [56, 0], sizes = [8, 32], strides = [1, 1]} : vector<64x32xf32> to vector<8x32xf32>
    %cst_15 = arith.constant dense<0.000000e+00> : vector<8x32xf32>
    %37 = tpu.matmul %35, %6, %cst_15 {dimension_numbers = #tpu.dot_dimension_numbers<[1], [0], [0], [1], [0, 0, 1, 1], [], []>} : vector<8x32xf32>, vector<32x32xf32>, vector<8x32xf32> -> vector<8x32xf32>
    %38 = arith.addf %36, %37 : vector<8x32xf32>
    %39 = math.tanh %38 : vector<8x32xf32>
    %40 = vector.shape_cast %11 : vector<8x32xf32> to vector<1x8x32xf32>
    %41 = vector.shape_cast %15 : vector<8x32xf32> to vector<1x8x32xf32>
    %42 = vector.shape_cast %19 : vector<8x32xf32> to vector<1x8x32xf32>
    %43 = vector.shape_cast %23 : vector<8x32xf32> to vector<1x8x32xf32>
    %44 = vector.shape_cast %27 : vector<8x32xf32> to vector<1x8x32xf32>
    %45 = vector.shape_cast %31 : vector<8x32xf32> to vector<1x8x32xf32>
    %46 = vector.shape_cast %35 : vector<8x32xf32> to vector<1x8x32xf32>
    %47 = vector.shape_cast %39 : vector<8x32xf32> to vector<1x8x32xf32>
    %48 = tpu.concatenate %40, %41, %42, %43, %44, %45, %46, %47 in 0 : vector<1x8x32xf32>, vector<1x8x32xf32>, vector<1x8x32xf32>, vector<1x8x32xf32>, vector<1x8x32xf32>, vector<1x8x32xf32>, vector<1x8x32xf32>, vector<1x8x32xf32> -> vector<8x8x32xf32>
    %49 = tpu.transpose %48, [1, 0, 2] : vector<8x8x32xf32> -> vector<8x8x32xf32>
    %50 = vector.shape_cast %39 : vector<8x32xf32> to vector<8x1x32xf32>
    %51 = vector.broadcast %50 : vector<8x1x32xf32> to vector<8x8x32xf32>
    %52 = arith.mulf %49, %51 : vector<8x8x32xf32>
    %cst_16 = arith.constant dense<0.000000e+00> : vector<8x8xf32>
    %53 = vector.multi_reduction <add>, %52, %cst_16 [2] : vector<8x8x32xf32> to vector<8x8xf32>
    %cst_17 = arith.constant dense<0xFF800000> : vector<8xf32>
    %54 = vector.multi_reduction <maximumf>, %53, %cst_17 [1] : vector<8x8xf32> to vector<8xf32>
    %55 = vector.shape_cast %54 : vector<8xf32> to vector<8x1xf32>
    %56 = vector.broadcast %55 : vector<8x1xf32> to vector<8x8xf32>
    %57 = arith.subf %53, %56 : vector<8x8xf32>
    %58 = math.exp %57 : vector<8x8xf32>
    %cst_18 = arith.constant dense<0.000000e+00> : vector<8xf32>
    %59 = vector.multi_reduction <add>, %58, %cst_18 [1] : vector<8x8xf32> to vector<8xf32>
    %60 = vector.shape_cast %59 : vector<8xf32> to vector<8x1xf32>
    %61 = tpu.reciprocal %60 {approx = true} : vector<8x1xf32> -> vector<8x1xf32>
    %62 = vector.broadcast %61 : vector<8x1xf32> to vector<8x8xf32>
    %63 = arith.mulf %58, %62 : vector<8x8xf32>
    %64 = vector.shape_cast %63 : vector<8x8xf32> to vector<8x8x1xf32>
    %65 = vector.broadcast %64 : vector<8x8x1xf32> to vector<8x8x32xf32>
    %66 = arith.mulf %65, %49 : vector<8x8x32xf32>
    %cst_19 = arith.constant dense<0.000000e+00> : vector<8x32xf32>
    %67 = vector.multi_reduction <add>, %66, %cst_19 [1] : vector<8x8x32xf32> to vector<8x32xf32>
    %c0_20 = arith.constant 0 : index
    %c0_21 = arith.constant 0 : index
    %68 = vector.load %arg4[%c0_20, %c0_21] : memref<32x8xf32, #tpu.memory_space<vmem>>, vector<32x8xf32>
    %cst_22 = arith.constant dense<0.000000e+00> : vector<8x8xf32>
    %69 = tpu.matmul %67, %68, %cst_22 {dimension_numbers = #tpu.dot_dimension_numbers<[1], [0], [0], [1], [0, 0, 1, 1], [], []>} : vector<8x32xf32>, vector<32x8xf32>, vector<8x8xf32> -> vector<8x8xf32>
    %c0_23 = arith.constant 0 : index
    %c0_24 = arith.constant 0 : index
    %70 = vector.load %arg5[%c0_23, %c0_24] : memref<1x8xf32, #tpu.memory_space<vmem>>, vector<1x8xf32>
    %71 = vector.broadcast %70 : vector<1x8xf32> to vector<8x8xf32>
    %72 = arith.addf %69, %71 : vector<8x8xf32>
    %c0_25 = arith.constant 0 : index
    %c0_26 = arith.constant 0 : index
    %73 = vector.load %arg6[%c0_25, %c0_26] : memref<8x8xf32, #tpu.memory_space<vmem>>, vector<8x8xf32>
    tpu.vector_store %arg6[%c0_25, %c0_26], %72 {strides = array<i32>} : memref<8x8xf32, #tpu.memory_space<vmem>>, vector<8x8xf32>,
    return
  }
}

</mosaic_0001>

<bundles_post_ra>
// kernel: attention_rnn.1
= control target key start
LH: loop header
LB: loop body
LE: loop exit
PB: predicated region body
PF: predicated region fallthrough
CT: control target
= control target key end

     0   :  { %v1755_v3 = vmov 0.0   ;;  %vm41_vm0 = vcmask 130048   ;;  %s2179_s0 = inlined_call_operand.vmem [shape: f32[64,16], index: 0, kind: input, shape index: {}]   ;;  %s2180_s1 = inlined_call_operand.vmem [shape: f32[16,32], index: 1, kind: input, shape index: {}]   ;;  %s2181_s2 = inlined_call_operand.vmem [shape: f32[32,32], index: 2, kind: input, shape index: {}]   ;;  %s2182_s3 = inlined_call_operand.vmem [shape: f32[1,32], index: 3, kind: input, shape index: {}]   ;;  %s2183_s4 = inlined_call_operand.vmem [shape: f32[32,8], index: 4, kind: input, shape index: {}]   ;;  %s2184_s5 = inlined_call_operand.vmem [shape: f32[1,8], index: 5, kind: input, shape index: {}]   ;;  %s2185_s6 = inlined_call_operand.hbm [shape: f32[8,8], index: 6, kind: output, shape index: {}]  }
   0x1   :  { %v33_v0 = vld [vmem:[%s2180_s1 + $0x8] sm:$0xff]  ;;  %v1803_v1 = vld [vmem:[%s2181_s2 + $0x18] sm:$0xff]  ;;  %v32_v2 = vld [vmem:[%s2180_s1] sm:$0xff]  ;;  %1591 = vmatprep.subr.mxu1 %v1755_v3 }
   0x2   :  { %1575 = vmatprep.subr.mxu0 %v33_v0  ;;  %v24_v4 = vld [vmem:[%s2179_s0] sm:$0xff]  ;;  %1592 = vmatpush3.msra.mxu1 %v1803_v1  ;;  %v1816_v5 = vld [vmem:[%s2181_s2 + $0x10] sm:$0xff]  ;;  %v25_v6 = vld [vmem:[%s2179_s0 + $0x8] sm:$0xff] }
   0x3   :  { %1576 = vmatpush3.msra.mxu0 %v33_v0 }
   0x4   :  { %11 = vsyncpa [#allocation3], 0  ;;  %1577 = vmatprep.subr.mxu0 %v32_v2  ;;  %1593 = vmatprep.subr.mxu1 %v1755_v3  ;;  %v1826_v7 = vld [vmem:[%s2181_s2 + $0x8] sm:$0xff]  ;;  %v1834_v8 = vld [vmem:[%s2181_s2] sm:$0xff]  ;;  %vm1756_vm1 = vmmov 0   ;;  %vm175_vm2 = vcmask 261120   ;;  %v781_v45 = vlaneseq }
   0x5   :  { %1578 = vmatpush3.msra.mxu0 %v32_v2  ;;  %1579 = vmatprep.mubr.msk.f32.mxu0 %vm41_vm0, %v24_v4  ;;  %v1865_v10 = vld [vmem:[%s2182_s3] ss:$0 sm:$0xff]  ;;  %v26_v17 = vld [vmem:[%s2179_s0 + $0x10] sm:$0xff]  ;;  %v27_v18 = vld [vmem:[%s2179_s0 + $0x18] sm:$0xff]  ;;  %v1757_v43 = vmov 1983009808  }
   0x6   :  { %1594 = vmatpush3.msra.mxu1 %v1816_v5  ;;  %1580 = vmatmul.mubr.msk.f32.vlgmr.msra.gmra.mxu0 %vm41_vm0, %v25_v6  ;;  %v28_v19 = vld [vmem:[%s2179_s0 + $0x20] sm:$0xff]  ;;  %v29_v20 = vld [vmem:[%s2179_s0 + $0x28] sm:$0xff]  ;;  %v30_v21 = vld [vmem:[%s2179_s0 + $0x30] sm:$0xff]  ;;  %v779_v44 = vunpack.c.l.s4 %v1757_v43  ;;  %v1940_v47 = vshrl.u32 %v781_v45, 7  ;;  %vm1076_vm3 = vcmask 1041409   ;;  %vm1078_vm4 = vcmask 1042434  }
   0x7   :  { %1595 = vmatprep.subr.mxu1 %v1755_v3  ;;  %1599 = vmatprep.mubr.msk.f32.mxu1 %vm1756_vm1, %v1755_v3  ;;  %v31_v22 = vld [vmem:[%s2179_s0 + $0x38] sm:$0xff]  ;;  %vm1080_vm5 = vcmask 1043459   ;;  %vm1082_vm6 = vcmask 1044484   ;;  %vm1084_vm7 = vcmask 1045509   ;;  %vm1086_vm8 = vcmask 1046534   ;;  %s1761_s8 = smov [#allocation2]  }
   0x8   :  { %1596 = vmatpush3.msra.mxu1 %v1826_v7  ;;  %1613 = vmatprep.subr.mxu0 %v1755_v3  ;;  %v780_v46 = vunpack.c.0.s8 %v779_v44  ;;  %vm1088_vm9 = vcmask 1047559   ;;  %vm1091_vm10 = vcmask 64512   ;;  %s1494_s1 = sshll.u32 %s1761_s8, 4  ;;  %s1495_s1 = int_to_ptr.vmem [resolvable:$true] %s1494_s1 }
   0x9   :  { %1597 = vmatprep.subr.mxu1 %v1755_v3  ;;  %1614 = vmatpush3.msra.mxu0 %v1803_v1  ;;  %s1733_s9 = scalar_lea.vmem %s1495_s1, 128  ;;  %p1738_p1 = scmp.lt.s32.totalorder %s1495_s1, %s1495_s1 }
   0xa   :  { %1598 = vmatpush3.msra.mxu1 %v1834_v8  ;;  %1615 = vmatprep.subr.mxu0 %v1755_v3  ;;  %v1944_v49 = vsub.s32 %v780_v46, %v1940_v47  ;;  %p1734_p0 = scmp.ne.s32.totalorder %s1495_s1, %s1733_s9  ;;  %p1739_p2 = scmp.lt.s32.totalorder %s1733_s9, %s1733_s9 }
   0xb   :  { %1600 = vmatmul.mubr.f32.vlgmr.msra.gmra.mxu1 %v1755_v3  ;;  %1602 = vmatprep.subr.mxu1 %v1755_v3 }
   0xc   :  { %1603 = vmatpush3.msra.mxu1 %v1803_v1  ;;  %1610 = vmatprep.mubr.msk.f32.mxu1 %vm1756_vm1, %v1755_v3  ;;  %p1740_p3 = por %p1739_p2, %p1738_p1 }
   0xd   :  { %1604 = vmatprep.subr.mxu1 %v1755_v3  ;;  %1616 = vmatpush3.msra.mxu0 %v1816_v5 }
   0xe   :  { %1605 = vmatpush3.msra.mxu1 %v1816_v5  ;;  %1617 = vmatprep.subr.mxu0 %v1755_v3  ;;  %p1741_p4 = pnand %p1740_p3, %p1734_p0 }
   0xf   :  { %1606 = vmatprep.subr.mxu1 %v1755_v3  ;;  %1618 = vmatpush3.msra.mxu0 %v1826_v7 }
  0x10   :  { %1607 = vmatpush3.msra.mxu1 %v1826_v7  ;;  %1619 = vmatprep.subr.mxu0 %v1755_v3 }
  0x11   :  { %1608 = vmatprep.subr.mxu1 %v1755_v3  ;;  %1620 = vmatpush3.msra.mxu0 %v1834_v8 }
  0x12   :  { %1609 = vmatpush3.msra.mxu1 %v1834_v8  ;;  %1635 = vmatprep.subr.mxu0 %v1755_v3 }
  0x13   :  { %1624 = vmatprep.subr.mxu1 %v1755_v3  ;;  %1582 = vmatprep.mubr.msk.f32.mxu0 %vm41_vm0, %v26_v17 }
  0x14   :  { %1583 = vmatmul.mubr.msk.f32.gmra.mxu0 %vm41_vm0, %v27_v18 }
  0x15   :  { %1585 = vmatprep.mubr.msk.f32.mxu0 %vm41_vm0, %v28_v19  ;;  %v1758_v19 = vmov 1966171168  }
  0x18   :  { %1586 = vmatmul.mubr.msk.f32.gmra.mxu0 %vm41_vm0, %v29_v20  ;;  %v915_v20 = vunpack.c.l.s4 %v1758_v19 }
  0x19   :  { %1588 = vmatprep.mubr.msk.f32.mxu0 %vm41_vm0, %v30_v21  ;;  %v1759_v21 = vmov 1934713408  }
  0x1c   :  { %1589 = vmatmul.mubr.msk.f32.gmra.mxu0 %vm41_vm0, %v31_v22  ;;  %v843_v22 = vunpack.c.l.s4 %v1759_v21 }
  0x1d   :  { %1621 = vmatprep.mubr.msk.f32.mxu0 %vm1756_vm1, %v1755_v3 }
  0xc6   :  { %v1581_v9 = vpop.f32.mrf.mxu0 }
  0xc7   :  { %v138_v23 = vadd.f32 %v1581_v9, %v1865_v10 }
  0xc8   :  { %v132_v11 = vpop.f32.mrf.mxu0 }
  0xc9   :  { %v133_v12 = vadd.f32 %v1865_v10, %v132_v11 }
  0xcb   :  { %v245_v13 = vpop.f32.mrf.mxu1 }
  0xcc   :  { %v249_v14 = vadd.f32 %v245_v13, %v133_v12 }
  0xcd   :  { %v1601_v15 = vpop.f32.mrf.mxu1 }
  0xce   :  { %1699 = vtanh.f32 %v249_v14 }
  0xd4   :  { %v1584_v28 = vpop.f32.mrf.mxu0 }
  0xd5   :  { %v148_v39 = vadd.f32 %v1584_v28, %v1865_v10 }
  0xd6   :  { %v142_v29 = vpop.f32.mrf.mxu0 }
  0xd7   :  { %v143_v34 = vadd.f32 %v1865_v10, %v142_v29 }
  0xd8   :  { %v1920_v30 = vpop.f32.mrf.mxu0 }
  0xd9   :  { %v158_v6 = vadd.f32 %v1920_v30, %v1865_v10 }
  0xda   :  { %v152_v31 = vpop.f32.mrf.mxu0 }
  0xdb   :  { %v1868_v16 = vpop.eup %1699  ;;  %v153_v62 = vadd.f32 %v1865_v10, %v152_v31 }
  0xdc   :  { %1611 = vmatmul.mubr.msk.f32.vlgmr.msra.gmra.mxu1 %vm175_vm2, %v1868_v16  ;;  %v1922_v32 = vpop.f32.mrf.mxu0 }
  0xdd   :  { %1625 = vmatpush3.msra.mxu1 %v1803_v1  ;;  %1632 = vmatprep.mubr.msk.f32.mxu1 %vm1756_vm1, %v1755_v3  ;;  %v168_v15 = vadd.f32 %v1922_v32, %v1865_v10 }
  0xde   :  { %1626 = vmatprep.subr.mxu1 %v1755_v3  ;;  %v1924_v33 = vpop.f32.mrf.mxu0 }
  0xdf   :  { %1627 = vmatpush3.msra.mxu1 %v1816_v5 }
  0xe0   :  { %1628 = vmatprep.subr.mxu1 %v1755_v3 }
  0xe1   :  { %1629 = vmatpush3.msra.mxu1 %v1826_v7 }
  0xe2   :  { %1630 = vmatprep.subr.mxu1 %v1755_v3 }
  0xe3   :  { %1631 = vmatpush3.msra.mxu1 %v1834_v8 }
  0xe4   :  { %1646 = vmatprep.subr.mxu1 %v1755_v3 }
 0x19c   :  { %v320_v24 = vpop.f32.mrf.mxu1 }
 0x19d   :  { %v324_v25 = vadd.f32 %v320_v24, %v138_v23  ;;  %v916_v23 = vunpack.c.0.s8 %v915_v20  ;;  %v844_v24 = vunpack.c.0.s8 %v843_v22 }
 0x19e   :  { %v1612_v26 = vpop.f32.mrf.mxu1 }
 0x19f   :  { %1701 = vtanh.f32 %v324_v25  ;;  %v919_v25 = vsub.s32 %v916_v23, %v1940_v47  ;;  %v847_v28 = vsub.s32 %v844_v24, %v1940_v47 }
 0x1ac   :  { %v1702_v27 = vpop.eup %1701 }
 0x1ad   :  { %1622 = vmatmul.mubr.msk.f32.vlgmr.msra.gmra.mxu0 %vm175_vm2, %v1702_v27 }
 0x1ae   :  { %1636 = vmatpush3.msra.mxu0 %v1803_v1  ;;  %1643 = vmatprep.mubr.msk.f32.mxu0 %vm1756_vm1, %v1755_v3 }
 0x1af   :  { %1637 = vmatprep.subr.mxu0 %v1755_v3 }
 0x1b0   :  { %1638 = vmatpush3.msra.mxu0 %v1816_v5 }
 0x1b1   :  { %1639 = vmatprep.subr.mxu0 %v1755_v3 }
 0x1b2   :  { %1640 = vmatpush3.msra.mxu0 %v1826_v7 }
 0x1b3   :  { %1641 = vmatprep.subr.mxu0 %v1755_v3 }
 0x1b4   :  { %1642 = vmatpush3.msra.mxu0 %v1834_v8 }
 0x1b5   :  { %1657 = vmatprep.subr.mxu0 %v1755_v3 }
 0x26d   :  { %v395_v35 = vpop.f32.mrf.mxu0 }
 0x26e   :  { %v399_v36 = vadd.f32 %v395_v35, %v143_v34  ;;  %v2003_v34 = vsub.s32 0, %v1940_v47 }
 0x26f   :  { %v1623_v37 = vpop.f32.mrf.mxu0 }
 0x270   :  { %1703 = vtanh.f32 %v399_v36 }
 0x27d   :  { %v1704_v38 = vpop.eup %1703 }
 0x27e   :  { %1633 = vmatmul.mubr.msk.f32.vlgmr.msra.gmra.mxu1 %vm175_vm2, %v1704_v38  ;;  %v776_v48 = vcombine.low %v1868_v16, %v1704_v38  ;;  %v777_v50 = vcombine.high %v1868_v16, %v1704_v38 }
 0x27f   :  { %1647 = vmatpush3.msra.mxu1 %v1803_v1  ;;  %1654 = vmatprep.mubr.msk.f32.mxu1 %vm1756_vm1, %v1755_v3 }
 0x280   :  { %1648 = vmatprep.subr.mxu1 %v1755_v3  ;;  %v1953_v54 = vrot.slane %v776_v48, %v1944_v49  ;;  %v1959_v56 = vrot.slane %v777_v50, %v1944_v49 }
 0x281   :  { %1649 = vmatpush3.msra.mxu1 %v1816_v5 }
 0x282   :  { %1650 = vmatprep.subr.mxu1 %v1755_v3 }
 0x283   :  { %1651 = vmatpush3.msra.mxu1 %v1826_v7 }
 0x284   :  { %1652 = vmatprep.subr.mxu1 %v1755_v3 }
 0x285   :  { %1653 = vmatpush3.msra.mxu1 %v1834_v8 }
 0x286   :  { %1668 = vmatprep.subr.mxu1 %v1755_v3 }
 0x33e   :  { %v470_v40 = vpop.f32.mrf.mxu1 }
 0x33f   :  { %v474_v41 = vadd.f32 %v470_v40, %v148_v39 }
 0x340   :  { %v1634_v42 = vpop.f32.mrf.mxu1 }
 0x341   :  { %1705 = vtanh.f32 %v474_v41 }
 0x34e   :  { %v1706_v51 = vpop.eup %1705 }
 0x34f   :  { %1644 = vmatmul.mubr.msk.f32.vlgmr.msra.gmra.mxu0 %vm175_vm2, %v1706_v51  ;;  %v792_v52 = vcombine.low %v1702_v27, %v1706_v51  ;;  %v793_v53 = vcombine.high %v1702_v27, %v1706_v51 }
 0x350   :  { %1658 = vmatpush3.msra.mxu0 %v1803_v1  ;;  %1665 = vmatprep.mubr.msk.f32.mxu0 %vm1756_vm1, %v1755_v3 }
 0x351   :  { %1659 = vmatprep.subr.mxu0 %v1755_v3  ;;  %v1956_v55 = vrot.slane %v792_v52, %v1944_v49  ;;  %v1962_v57 = vrot.slane %v793_v53, %v1944_v49 }
 0x352   :  { %1660 = vmatpush3.msra.mxu0 %v1816_v5 }
 0x353   :  { %1661 = vmatprep.subr.mxu0 %v1755_v3  ;;  %v841_v58 = vcombine.high %v1953_v54, %v1956_v55  ;;  %v840_v59 = vcombine.low %v1953_v54, %v1956_v55  ;;  %v856_v60 = vcombine.low %v1959_v56, %v1962_v57  ;;  %v857_v61 = vcombine.high %v1959_v56, %v1962_v57 }
 0x354   :  { %1662 = vmatpush3.msra.mxu0 %v1826_v7 }
 0x355   :  { %1663 = vmatprep.subr.mxu0 %v1755_v3  ;;  %v855_v39 = vrot.slane %v841_v58, %v847_v28  ;;  %v848_v44 = vrot.slane %v840_v59, %v847_v28  ;;  %v864_v50 = vrot.slane %v856_v60, %v847_v28 }
 0x356   :  { %1664 = vmatpush3.msra.mxu0 %v1834_v8 }
 0x357   :  { %1679 = vmatprep.subr.mxu0 %v1755_v3 }
 0x40f   :  { %v545_v63 = vpop.f32.mrf.mxu0 }
 0x410   :  { %v549_v0 = vadd.f32 %v545_v63, %v153_v62 }
 0x411   :  { %v1645_v2 = vpop.f32.mrf.mxu0 }
 0x412   :  { %1707 = vtanh.f32 %v549_v0 }
 0x41f   :  { %v1708_v4 = vpop.eup %1707 }
 0x420   :  { %1655 = vmatmul.mubr.msk.f32.vlgmr.msra.gmra.mxu1 %vm175_vm2, %v1708_v4 }
 0x421   :  { %1669 = vmatpush3.msra.mxu1 %v1803_v1  ;;  %1676 = vmatprep.mubr.msk.f32.mxu1 %vm1756_vm1, %v1755_v3 }
 0x422   :  { %1670 = vmatprep.subr.mxu1 %v1755_v3 }
 0x423   :  { %1671 = vmatpush3.msra.mxu1 %v1816_v5  ;;  %v163_v5 = vadd.f32 %v1865_v10, %v1924_v33 }
 0x424   :  { %1672 = vmatprep.subr.mxu1 %v1755_v3 }
 0x425   :  { %1673 = vmatpush3.msra.mxu1 %v1826_v7 }
 0x426   :  { %1674 = vmatprep.subr.mxu1 %v1755_v3 }
 0x427   :  { %1675 = vmatpush3.msra.mxu1 %v1834_v8 }
 0x4e0   :  { %v620_v9 = vpop.f32.mrf.mxu1 }
 0x4e1   :  { %v624_v1 = vadd.f32 %v620_v9, %v158_v6 }
 0x4e2   :  { %v1656_v11 = vpop.f32.mrf.mxu1 }
 0x4e3   :  { %1709 = vtanh.f32 %v624_v1 }
 0x4f0   :  { %v1710_v12 = vpop.eup %1709 }
 0x4f1   :  { %1666 = vmatmul.mubr.msk.f32.vlgmr.msra.gmra.mxu0 %vm175_vm2, %v1710_v12 }
 0x4f2   :  { %1687 = vmatprep.mubr.msk.f32.mxu0 %vm1756_vm1, %v1755_v3 }
 0x5b1   :  { %v695_v7 = vpop.f32.mrf.mxu0 }
 0x5b2   :  { %v699_v13 = vadd.f32 %v695_v7, %v163_v5 }
 0x5b3   :  { %v1667_v14 = vpop.f32.mrf.mxu0 }
 0x5b4   :  { %1711 = vtanh.f32 %v699_v13 }
 0x5c1   :  { %v1712_v8 = vpop.eup %1711 }
 0x5c2   :  { %1677 = vmatmul.mubr.msk.f32.vlgmr.msra.gmra.mxu1 %vm175_vm2, %v1712_v8  ;;  %v808_v26 = vcombine.low %v1708_v4, %v1712_v8  ;;  %v809_v29 = vcombine.high %v1708_v4, %v1712_v8  ;;  %v871_v8 = vrot.slane %v857_v61, %v847_v28 }
 0x5c4   :  { %v816_v33 = vrot.slane %v808_v26, %v1944_v49  ;;  %v823_v40 = vrot.slane %v809_v29, %v1944_v49 }
 0x682   :  { %v770_v16 = vpop.f32.mrf.mxu1 }
 0x683   :  { %v774_v17 = vadd.f32 %v770_v16, %v168_v15 }
 0x684   :  { %v1678_v18 = vpop.f32.mrf.mxu1 }
 0x685   :  { %1713 = vtanh.f32 %v774_v17 }
 0x692   :  { %v1714_v27 = vpop.eup %1713 }
 0x693   :  { %v824_v30 = vcombine.low %v1710_v12, %v1714_v27  ;;  %v920_v31 = vrot.slane %v1714_v27, %v919_v25  ;;  %v825_v10 = vcombine.high %v1710_v12, %v1714_v27  ;;  %v913_v32 = vcombine.high %v1714_v27, %v1714_v27 }
 0x695   :  { %v832_v35 = vrot.slane %v824_v30, %v1944_v49  ;;  %v936_v36 = vrot.slane %v920_v31, %v919_v25  ;;  %v928_v37 = vcombine.high %v920_v31, %v920_v31  ;;  %v839_v38 = vrot.slane %v825_v10, %v1944_v49 }
 0x696   :  { %v927_v41 = vrot.slane %v913_v32, %v919_v25  ;;  %v1043_v32 = vand.u32 127, %v781_v45 }
 0x697   :  { %v873_v42 = vcombine.high %v816_v33, %v832_v35  ;;  %v958_v43 = vcombine.high %v936_v36, %v936_v36  ;;  %v872_v46 = vcombine.low %v816_v33, %v832_v35  ;;  %v950_v48 = vrot.slane %v928_v37, %v919_v25 }
 0x698   :  { %v888_v51 = vcombine.low %v823_v40, %v839_v38  ;;  %v929_v52 = vcombine.high %v927_v41, %v927_v41  ;;  %v965_v58 = vrot.slane %v936_v36, %v2003_v34  ;;  %v889_v49 = vcombine.high %v823_v40, %v839_v38 }
 0x699   :  { %v887_v53 = vrot.slane %v873_v42, %v847_v28  ;;  %v880_v62 = vrot.slane %v872_v46, %v847_v28  ;;  %v973_v63 = vrot.slane %v958_v43, %v2003_v34  ;;  %v960_v0 = vcombine.high %v950_v48, %v950_v48 }
 0x69a   :  { %v896_v2 = vrot.slane %v888_v51, %v847_v28  ;;  %v957_v4 = vrot.slane %v929_v52, %v919_v25  ;;  %v969_v9 = vrot.slane %v950_v48, %v2003_v34  ;;  %v943_v7 = vrot.slane %v927_v41, %v919_v25 }
 0x69b   :  { %v2019_v54 = vcombine.low %v855_v39, %v887_v53  ;;  %v2021_v55 = vcombine.low %v848_v44, %v880_v62  ;;  %v2023_v59 = vcombine.high %v855_v39, %v887_v53  ;;  %v2025_v6 = vcombine.high %v848_v44, %v880_v62 }
 0x69c   :  { %v977_v60 = vrot.slane %v960_v0, %v2003_v34  ;;  %v2029_v1 = vcombine.high %v864_v50, %v896_v2  ;;  %v2031_v11 = vcombine.low %v864_v50, %v896_v2  ;;  %v985_v14 = vrot.slane %v957_v4, %v2003_v34 }
 0x69d   :  { %v1004_v12 = vmul.f32 %v973_v63, %v2019_v54  ;;  %v1002_v5 = vmul.f32 %v965_v58, %v2021_v55  ;;  %v1003_v13 = vmul.f32 %v969_v9, %v2025_v6  ;;  %v903_v15 = vrot.slane %v889_v49, %v847_v28 }
 0x69e   :  { %v1005_v18 = vmul.f32 %v977_v60, %v2023_v59  ;;  %v961_v19 = vcombine.high %v957_v4, %v957_v4  ;;  %v981_v21 = vrot.slane %v943_v7, %v2003_v34  ;;  %v959_v23 = vcombine.high %v943_v7, %v943_v7 }
 0x69f   :  { %v1016_v16 = vsel %vm175_vm2, %v1004_v12, 0.0  ;;  %v1010_v17 = vsel %vm175_vm2, %v1002_v5, 0.0  ;;  %v2043_v20 = vcombine.high %v871_v8, %v903_v15  ;;  %v2046_v22 = vcombine.low %v871_v8, %v903_v15 }
 0x6a0   :  { %1017 = vadd.xlane.f32.xlu1 %v1016_v16  ;;  %1011 = vadd.xlane.f32.xlu0 %v1010_v17  ;;  %v1013_v56 = vsel %vm175_vm2, %v1003_v13, 0.0  ;;  %v1007_v57 = vmul.f32 %v985_v14, %v2029_v1  ;;  %v1019_v61 = vsel %vm175_vm2, %v1005_v18, 0.0  ;;  %v1006_v24 = vmul.f32 %v981_v21, %v2031_v11 }
 0x6a1   :  { %v993_v25 = vrot.slane %v961_v19, %v2003_v34  ;;  %v989_v26 = vrot.slane %v959_v23, %v2003_v34  ;;  %v2062_v36 = vsub.s32 %v1043_v32, %v1940_v47  ;;  %v1760_v60 = vmov 0  }
 0x6a2   :  { %v1025_v27 = vsel %vm175_vm2, %v1007_v57, 0.0  ;;  %v1022_v28 = vsel %vm175_vm2, %v1006_v24, 0.0  ;;  %1698 = vset.pattern.permute.xlu0 %v1760_v60  ;;  %1697 = vset.pattern.permute.xlu1 %v1760_v60  ;;  %v1102_v9 = vsub.s32 1, %v1940_v47  ;;  %v1106_v12 = vsub.s32 2, %v1940_v47 }
 0x6a3   :  { %v1009_v29 = vmul.f32 %v993_v25, %v2043_v20  ;;  %v1008_v30 = vmul.f32 %v989_v26, %v2046_v22  ;;  %v1110_v5 = vsub.s32 3, %v1940_v47  ;;  %v1114_v15 = vsub.s32 4, %v1940_v47 }
 0x6a4   :  { %1020 = vadd.xlane.f32.xlu1 %v1019_v61  ;;  %1014 = vadd.xlane.f32.xlu0 %v1013_v56  ;;  %v1118_v56 = vsub.s32 5, %v1940_v47  ;;  %v1122_v25 = vsub.s32 6, %v1940_v47 }
 0x6a5   :  { %v1031_v31 = vsel %vm175_vm2, %v1009_v29, 0.0  ;;  %v1028_v10 = vsel %vm175_vm2, %v1008_v30, 0.0  ;;  %v1126_v29 = vsub.s32 7, %v1940_v47  ;;  %v1389_v47 = vld [vmem:[%s2183_s4] sm:$0xff] }
 0x6a8   :  { %1026 = vadd.xlane.f32.xlu1 %v1025_v27  ;;  %1023 = vadd.xlane.f32.xlu0 %v1022_v28 }
 0x6ac   :  { %1032 = vadd.xlane.f32.xlu1 %v1031_v31  ;;  %1029 = vadd.xlane.f32.xlu0 %v1028_v10 }
 0x729   :  { %v1018_v33 = vpop.xlane.xlu1 %1017  ;;  %v1012_v35 = vpop.xlane.xlu0 %1011 }
 0x72a   :  { %v1047_v39 = vrot.slane %v1012_v35, %v2062_v36  ;;  %v1055_v41 = vrot.slane %v1018_v33, %v2062_v36 }
 0x72d   :  { %v1021_v37 = vpop.xlane.xlu1 %1020  ;;  %v1015_v38 = vpop.xlane.xlu0 %1014 }
 0x72e   :  { %v1051_v40 = vrot.slane %v1015_v38, %v2062_v36  ;;  %v1059_v42 = vrot.slane %v1021_v37, %v2062_v36 }
 0x730   :  { %v1077_v45 = vsel %vm1076_vm3, %v1051_v40, %v1047_v39 }
 0x731   :  { %v1079_v43 = vsel %vm1078_vm4, %v1055_v41, %v1077_v45  ;;  %v1027_v44 = vpop.xlane.xlu1 %1026  ;;  %v1024_v46 = vpop.xlane.xlu0 %1023 }
 0x732   :  { %v1081_v48 = vsel %vm1080_vm5, %v1059_v42, %v1079_v43  ;;  %v1063_v50 = vrot.slane %v1024_v46, %v2062_v36  ;;  %v1067_v51 = vrot.slane %v1027_v44, %v2062_v36 }
 0x734   :  { %v1083_v52 = vsel %vm1082_vm6, %v1063_v50, %v1081_v48 }
 0x735   :  { %v1033_v53 = vpop.xlane.xlu1 %1032  ;;  %v1030_v62 = vpop.xlane.xlu0 %1029  ;;  %v1085_v63 = vsel %vm1084_vm7, %v1067_v51, %v1083_v52 }
 0x736   :  { %v1075_v58 = vrot.slane %v1033_v53, %v2062_v36  ;;  %v1071_v49 = vrot.slane %v1030_v62, %v2062_v36 }
 0x738   :  { %v1087_v0 = vsel %vm1086_vm8, %v1071_v49, %v1085_v63 }
 0x739   :  { %v1089_v2 = vsel %vm1088_vm9, %v1075_v58, %v1087_v0 }
 0x73a   :  { %v1092_v4 = vsel %vm1091_vm10, %v1089_v2, -inf }
 0x73b   :  { %1093 = vmax.xlane.f32.xlu0 %v1092_v4 }
 0x7c4   :  { %v1094_v7 = vpop.xlane.xlu0 %1093 }
 0x7c5   :  { %v1099_v13 = vrot.slane %v1094_v7, %v2003_v34  ;;  %v1103_v14 = vrot.slane %v1094_v7, %v1102_v9  ;;  %v1107_v8 = vrot.slane %v1094_v7, %v1106_v12  ;;  %v1111_v16 = vrot.slane %v1094_v7, %v1110_v5 }
 0x7c6   :  { %v1115_v57 = vrot.slane %v1094_v7, %v1114_v15  ;;  %v1119_v26 = vrot.slane %v1094_v7, %v1118_v56  ;;  %v1123_v30 = vrot.slane %v1094_v7, %v1122_v25  ;;  %v1127_v32 = vrot.slane %v1094_v7, %v1126_v29 }
 0x7c7   :  { %v1136_v17 = vsub.f32 %v1012_v35, %v1099_v13  ;;  %v1137_v18 = vsub.f32 %v1015_v38, %v1103_v14  ;;  %v1138_v19 = vsub.f32 %v1018_v33, %v1107_v8  ;;  %v1139_v61 = vsub.f32 %v1021_v37, %v1111_v16 }
 0x7c8   :  { %v1140_v27 = vsub.f32 %v1024_v46, %v1115_v57  ;;  %v1141_v31 = vsub.f32 %v1027_v44, %v1119_v26  ;;  %v1142_v33 = vsub.f32 %v1030_v62, %v1123_v30  ;;  %v1143_v39 = vsub.f32 %v1033_v53, %v1127_v32 }
 0x7c9   :  { %v1144_v21 = vmul.f32 1.442695, %v1136_v17  ;;  %v1146_v23 = vmul.f32 1.442695, %v1137_v18  ;;  %v1148_v24 = vmul.f32 1.442695, %v1138_v19 }
 0x7ca   :  { %v1150_v28 = vmul.f32 1.442695, %v1139_v61  ;;  %v1152_v10 = vmul.f32 1.442695, %v1140_v27  ;;  %v1154_v35 = vmul.f32 1.442695, %v1141_v31 }
 0x7cb   :  { %1715 = vpow2.f32 %v1144_v21  ;;  %v1156_v40 = vmul.f32 1.442695, %v1142_v33  ;;  %v1158_v42 = vmul.f32 1.442695, %v1143_v39 }
 0x7cc   :  { %1717 = vpow2.f32 %v1146_v23 }
 0x7cd   :  { %1719 = vpow2.f32 %v1148_v24 }
 0x7ce   :  { %1721 = vpow2.f32 %v1150_v28 }
 0x7cf   :  { %1723 = vpow2.f32 %v1152_v10 }
 0x7d0   :  { %1725 = vpow2.f32 %v1154_v35 }
 0x7d1   :  { %1727 = vpow2.f32 %v1156_v40 }
 0x7d2   :  { %1729 = vpow2.f32 %v1158_v42 }
 0x7d8   :  { %v1716_v37 = vpop.eup %1715 }
 0x7d9   :  { %v1718_v38 = vpop.eup %1717  ;;  %1169 = vperm.xlu1 %1697, %v1716_v37  }
 0x7da   :  { %1172 = vperm.xlu0 %1698, %v1718_v38   ;;  %v1720_v41 = vpop.eup %1719 }
 0x7db   :  { %v1722_v45 = vpop.eup %1721 }
 0x7dc   :  { %v1724_v43 = vpop.eup %1723 }
 0x7dd   :  { %1175 = vperm.xlu1 %1697, %v1720_v41   ;;  %v1726_v44 = vpop.eup %1725 }
 0x7de   :  { %v1728_v46 = vpop.eup %1727 }
 0x7df   :  { %v1730_v48 = vpop.eup %1729 }
 0x7e1   :  { %1178 = vperm.xlu1 %1697, %v1722_v45  }
 0x7e5   :  { %1181 = vperm.xlu1 %1697, %v1724_v43  }
 0x7e9   :  { %1184 = vperm.xlu1 %1697, %v1726_v44  }
 0x7ed   :  { %1187 = vperm.xlu1 %1697, %v1728_v46  }
 0x7f1   :  { %1190 = vperm.xlu1 %1697, %v1730_v48  }
 0x854   :  { %v1170_v50 = vpop.permute.xlu1 %1169 }
 0x855   :  { %v1173_v62 = vpop.permute.xlu0 %1172  ;;  %v1195_v63 = vrot.slane %v1170_v50, %v2062_v36 }
 0x856   :  { %v1199_v49 = vrot.slane %v1173_v62, %v2062_v36 }
 0x858   :  { %v1176_v51 = vpop.permute.xlu1 %1175  ;;  %v1224_v7 = vsel %vm1076_vm3, %v1199_v49, %v1195_v63 }
 0x859   :  { %v1203_v0 = vrot.slane %v1176_v51, %v2062_v36 }
 0x85b   :  { %v1225_v14 = vsel %vm1078_vm4, %v1203_v0, %v1224_v7 }
 0x85c   :  { %v1179_v52 = vpop.permute.xlu1 %1178 }
 0x85d   :  { %v1207_v2 = vrot.slane %v1179_v52, %v2062_v36 }
 0x85f   :  { %v1226_v16 = vsel %vm1080_vm5, %v1207_v2, %v1225_v14 }
 0x860   :  { %v1182_v53 = vpop.permute.xlu1 %1181 }
 0x861   :  { %v1211_v4 = vrot.slane %v1182_v53, %v2062_v36 }
 0x863   :  { %v1227_v17 = vsel %vm1082_vm6, %v1211_v4, %v1226_v16 }
 0x864   :  { %v1185_v58 = vpop.permute.xlu1 %1184 }
 0x865   :  { %v1215_v13 = vrot.slane %v1185_v58, %v2062_v36 }
 0x867   :  { %v1228_v19 = vsel %vm1084_vm7, %v1215_v13, %v1227_v17 }
 0x868   :  { %v1188_v60 = vpop.permute.xlu1 %1187 }
 0x869   :  { %v1219_v8 = vrot.slane %v1188_v60, %v2062_v36 }
 0x86b   :  { %v1229_v23 = vsel %vm1086_vm8, %v1219_v8, %v1228_v19 }
 0x86c   :  { %v1191_v18 = vpop.permute.xlu1 %1190 }
 0x86d   :  { %v1223_v21 = vrot.slane %v1191_v18, %v2062_v36 }
 0x86f   :  { %v1230_v57 = vsel %vm1088_vm9, %v1223_v21, %v1229_v23 }
 0x870   :  { %v1232_v61 = vsel %vm1091_vm10, %v1230_v57, 0.0 }
 0x871   :  { %1233 = vadd.xlane.f32.xlu1 %v1232_v61 }
 0x8fa   :  { %v1234_v24 = vpop.xlane.xlu1 %1233 }
 0x8fb   :  { %1731 = vrcp.f32 %v1234_v24 }
 0x908   :  { %v1732_v26 = vpop.eup %1731 }
 0x909   :  { %v1240_v27 = vrot.slane %v1732_v26, %v2003_v34  ;;  %v1244_v30 = vrot.slane %v1732_v26, %v1102_v9  ;;  %v1248_v36 = vrot.slane %v1732_v26, %v1106_v12  ;;  %v1252_v32 = vrot.slane %v1732_v26, %v1110_v5 }
 0x90a   :  { %v1256_v35 = vrot.slane %v1732_v26, %v1114_v15  ;;  %v1260_v9 = vrot.slane %v1732_v26, %v1118_v56  ;;  %v1264_v12 = vrot.slane %v1732_v26, %v1122_v25  ;;  %v1268_v5 = vrot.slane %v1732_v26, %v1126_v29  ;;  %v1392_v15 = vld [vmem:[%s2183_s4 + $0x18] sm:$0xff]  ;;  %v1391_v56 = vld [vmem:[%s2183_s4 + $0x10] sm:$0xff]  ;;  %v1390_v25 = vld [vmem:[%s2183_s4 + $0x8] sm:$0xff] }
 0x90b   :  { %v1277_v28 = vmul.f32 %v1716_v37, %v1240_v27  ;;  %v1278_v31 = vmul.f32 %v1718_v38, %v1244_v30  ;;  %v1279_v10 = vmul.f32 %v1720_v41, %v1248_v36  ;;  %v1280_v33 = vmul.f32 %v1722_v45, %v1252_v32  ;;  %1680 = vmatpush3.msra.mxu0 %v1392_v15 }
 0x90c   :  { %v1281_v34 = vmul.f32 %v1724_v43, %v1256_v35  ;;  %v1282_v37 = vmul.f32 %v1726_v44, %v1260_v9  ;;  %v1283_v38 = vmul.f32 %v1728_v46, %v1264_v12  ;;  %v1284_v39 = vmul.f32 %v1730_v48, %v1268_v5  ;;  %1681 = vmatprep.subr.mxu0 %v1755_v3 }
 0x90d   :  { %1287 = vperm.xlu0 %1698, %v1277_v28   ;;  %1682 = vmatpush3.msra.mxu0 %v1391_v56 }
 0x90e   :  { %1683 = vmatprep.subr.mxu0 %v1755_v3 }
 0x90f   :  { %1684 = vmatpush3.msra.mxu0 %v1390_v25 }
 0x910   :  { %1685 = vmatprep.subr.mxu0 %v1755_v3 }
 0x911   :  { %1292 = vperm.xlu0 %1698, %v1278_v31   ;;  %1686 = vmatpush3.msra.mxu0 %v1389_v47 }
 0x915   :  { %1297 = vperm.xlu0 %1698, %v1279_v10  }
 0x919   :  { %1302 = vperm.xlu0 %1698, %v1280_v33  }
 0x91d   :  { %1307 = vperm.xlu0 %1698, %v1281_v34  }
 0x921   :  { %1312 = vperm.xlu0 %1698, %v1282_v37  }
 0x925   :  { %1317 = vperm.xlu0 %1698, %v1283_v38  }
 0x929   :  { %1322 = vperm.xlu0 %1698, %v1284_v39  }
 0x988   :  { %v1288_v29 = vpop.permute.xlu0 %1287 }
 0x989   :  { %v1325_v45 = vmul.f32 %v1288_v29, %v2021_v55 }
 0x98b   :  { %v1333_v50 = vsel %vm175_vm2, %v1325_v45, 0.0 }
 0x98c   :  { %v1293_v40 = vpop.permute.xlu0 %1292  ;;  %v1334_v62 = vrot.slane %v1333_v50, 4 }
 0x98d   :  { %v1326_v41 = vmul.f32 %v1293_v40, %v2025_v6 }
 0x98e   :  { %v1335_v0 = vadd.f32 %v1334_v62, %v1333_v50 }
 0x98f   :  { %v1340_v44 = vsel %vm175_vm2, %v1326_v41, 0.0 }
 0x990   :  { %v1298_v42 = vpop.permute.xlu0 %1297  ;;  %v1341_v3 = vrot.slane %v1340_v44, 4  ;;  %v1336_v16 = vrot.slane %v1335_v0, 2 }
 0x991   :  { %v1327_v43 = vmul.f32 %v1298_v42, %v2019_v54 }
 0x992   :  { %v1342_v49 = vadd.f32 %v1341_v3, %v1340_v44  ;;  %v1337_v26 = vadd.f32 %v1336_v16, %v1335_v0 }
 0x993   :  { %v1347_v46 = vsel %vm175_vm2, %v1327_v43, 0.0 }
 0x994   :  { %v1303_v48 = vpop.permute.xlu0 %1302  ;;  %v1348_v52 = vrot.slane %v1347_v46, 4 }
 0x995   :  { %v1328_v51 = vmul.f32 %v1303_v48, %v2023_v59  ;;  %v1343_v59 = vrot.slane %v1342_v49, 2 }
 0x996   :  { %v1349_v54 = vadd.f32 %v1348_v52, %v1347_v46 }
 0x997   :  { %v1354_v53 = vsel %vm175_vm2, %v1328_v51, 0.0  ;;  %v1344_v23 = vadd.f32 %v1343_v59, %v1342_v49 }
 0x998   :  { %v1355_v6 = vrot.slane %v1354_v53, 4  ;;  %v1308_v58 = vpop.permute.xlu0 %1307  ;;  %v1350_v14 = vrot.slane %v1349_v54, 2 }
 0x999   :  { %v1329_v55 = vmul.f32 %v1308_v58, %v2031_v11  ;;  %v1345_v10 = vrot.slane %v1344_v23, 1 }
 0x99a   :  { %v1356_v2 = vadd.f32 %v1355_v6, %v1354_v53  ;;  %v1351_v61 = vadd.f32 %v1350_v14, %v1349_v54  ;;  %v1518_v6 = vld [vmem:[%s2184_s5] ss:$0 sm:$0xff] }
 0x99b   :  { %v1361_v63 = vsel %vm175_vm2, %v1329_v55, 0.0  ;;  %v1346_v5 = vadd.f32 %v1345_v10, %v1344_v23 }
 0x99c   :  { %v1362_v4 = vrot.slane %v1361_v63, 4  ;;  %v1313_v60 = vpop.permute.xlu0 %1312  ;;  %v1357_v17 = vrot.slane %v1356_v2, 2  ;;  %v1352_v35 = vrot.slane %v1351_v61, 1 }
 0x99d   :  { %v1330_v7 = vmul.f32 %v1313_v60, %v2029_v1 }
 0x99e   :  { %v1363_v13 = vadd.f32 %v1362_v4, %v1361_v63  ;;  %v1358_v27 = vadd.f32 %v1357_v17, %v1356_v2  ;;  %v1353_v25 = vadd.f32 %v1352_v35, %v1351_v61 }
 0x99f   :  { %v1368_v8 = vsel %vm175_vm2, %v1330_v7, 0.0 }
 0x9a0   :  { %v1369_v18 = vrot.slane %v1368_v8, 4  ;;  %v1318_v19 = vpop.permute.xlu0 %1317  ;;  %v1364_v11 = vrot.slane %v1363_v13, 2  ;;  %v1359_v9 = vrot.slane %v1358_v27, 1 }
 0x9a1   :  { %v1331_v21 = vmul.f32 %v1318_v19, %v2046_v22  ;;  %v1338_v22 = vrot.slane %v1337_v26, 1 }
 0x9a2   :  { %v1370_v57 = vadd.f32 %v1369_v18, %v1368_v8  ;;  %v1365_v31 = vadd.f32 %v1364_v11, %v1363_v13  ;;  %v1360_v29 = vadd.f32 %v1359_v9, %v1358_v27 }
 0x9a3   :  { %v1375_v24 = vsel %vm175_vm2, %v1331_v21, 0.0  ;;  %v1339_v47 = vadd.f32 %v1338_v22, %v1337_v26 }
 0x9a4   :  { %v1371_v1 = vrot.slane %v1370_v57, 2  ;;  %v1376_v28 = vrot.slane %v1375_v24, 4  ;;  %v1323_v30 = vpop.permute.xlu0 %1322  ;;  %v1366_v38 = vrot.slane %v1365_v31, 1 }
 0x9a5   :  { %v1332_v36 = vmul.f32 %v1323_v30, %v2043_v20  ;;  %v1408_v42 = vsel %vm1076_vm3, %v1346_v5, %v1339_v47 }
 0x9a6   :  { %v1372_v32 = vadd.f32 %v1371_v1, %v1370_v57  ;;  %v1377_v33 = vadd.f32 %v1376_v28, %v1375_v24  ;;  %v1367_v41 = vadd.f32 %v1366_v38, %v1365_v31  ;;  %v1409_v44 = vsel %vm1078_vm4, %v1353_v25, %v1408_v42 }
 0x9a7   :  { %v1382_v34 = vsel %vm175_vm2, %v1332_v36, 0.0  ;;  %v1410_v48 = vsel %vm1080_vm5, %v1360_v29, %v1409_v44 }
 0x9a8   :  { %v1378_v37 = vrot.slane %v1377_v33, 2  ;;  %v1383_v12 = vrot.slane %v1382_v34, 4  ;;  %v1373_v39 = vrot.slane %v1372_v32, 1  ;;  %v1411_v51 = vsel %vm1082_vm6, %v1367_v41, %v1410_v48 }
 0x9aa   :  { %v1379_v15 = vadd.f32 %v1378_v37, %v1377_v33  ;;  %v1384_v56 = vadd.f32 %v1383_v12, %v1382_v34  ;;  %v1374_v45 = vadd.f32 %v1373_v39, %v1372_v32 }
 0x9ac   :  { %v1380_v40 = vrot.slane %v1379_v15, 1  ;;  %v1385_v20 = vrot.slane %v1384_v56, 2  ;;  %v1412_v52 = vsel %vm1084_vm7, %v1374_v45, %v1411_v51 }
 0x9ae   :  { %v1386_v43 = vadd.f32 %v1385_v20, %v1384_v56  ;;  %v1381_v46 = vadd.f32 %v1380_v40, %v1379_v15 }
 0x9b0   :  { %v1387_v50 = vrot.slane %v1386_v43, 1  ;;  %v1413_v53 = vsel %vm1086_vm8, %v1381_v46, %v1412_v52 }
 0x9b2   :  { %v1388_v3 = vadd.f32 %v1387_v50, %v1386_v43 }
 0x9b4   :  { %v1414_v62 = vsel %vm1088_vm9, %v1388_v3, %v1413_v53 }
 0x9b5   :  { %1688 = vmatmul.mubr.msk.f32.vlgmr.msra.gmra.mxu0 %vm175_vm2, %v1414_v62 }
 0xa75   :  { %v1483_v58 = vpop.f32.mrf.mxu0 }
 0xa76   :  { %v1484_v55 = vadd.f32 %v1518_v6, %v1483_v58 }
 0xa77   :  { %v1689_v49 = vpop.f32.mrf.mxu0 }
 0xa78   :  { %1487 = vst.msk [vmem:[#allocation2] sm:$0xff] %vm1091_vm10, %v1484_v55 }
 0xa79   :  { %1744 = shalt.err (!%p1741_p4)
}
 0xa7a   :  { %1497 = dma.vmem_to_hbm [thread:$0]  %s1495_s1, 128, %s2185_s6, [#allocation3]  }
 0xa7b   :  { %1753 = dma.done.wait [#allocation3], 128  }
 0xa7c   :  { %1754 = vsyncadd [#allocation3], 4294967168 }
 0xa7d   :  { %1501 = vsyncpa [#allocation3], 1 }

</bundles_post_ra>
